<compile_context>
chip_gen: v7x
topology: tpu7x:2x2x1
jax: 0.10.0
libtpu: 0.0.40
codegen_flags: <defaults>
</compile_context>

<pallas_src>
import functools

import jax
import jax.numpy as jnp
from jax.experimental import pallas as pl
from jax.experimental.pallas import tpu as pltpu


def _round_up(v, m):
    return ((v + m - 1) // m) * m


def _spatial_attn_kernel(w_ref, b_ref, x_ref, o_ref, rows_ref, *, ksize, pad, hp):
    # x_ref block: (nb, C, L) batch slab; L is the full array extent.
    x = x_ref[...]                                           # native dtype
    nb, c, l = x.shape

    # Channel reductions (axis 1 == sublane axis of the (C, L) tiles).
    # Sum in f32 for accuracy; max is order-preserving so native dtype is exact.
    avg = jnp.mean(x.astype(jnp.float32), axis=1)            # (nb, L) f32
    mx = jnp.max(x, axis=1).astype(jnp.float32)              # (nb, L) f32

    # rows_ref: (2, nb, hp + Lpad) f32 scratch.  Zeroing it every step supplies
    # the Conv1d zero boundary on both sides (and stays correct when the grid is
    # sharded across TensorCores); avg/mx are parked at 128-aligned lane offset hp.
    rows_ref[...] = jnp.zeros_like(rows_ref)
    rows_ref[0, :, hp:hp + l] = avg
    rows_ref[1, :, hp:hp + l] = mx

    # Scalar conv taps live in SMEM; read them once before the tap loop.
    w_avg = [w_ref[0, k] for k in range(ksize)]
    w_max = [w_ref[1, k] for k in range(ksize)]

    # k-tap shift-and-MAC (cross-correlation, matches nn.Conv1d):
    #   pre[i] = b + sum_k w_avg[k]*avg[i+k-pad] + w_max[k]*mx[i+k-pad]
    pre = jnp.full((nb, l), b_ref[0], jnp.float32)
    for k in range(ksize):                                   # ksize is small & static
        off = hp + k - pad                                   # static, >= 0
        pre = pre + w_avg[k] * rows_ref[0, :, off:off + l] \
                  + w_max[k] * rows_ref[1, :, off:off + l]

    # Sigmoid on the EUP; the single O(C*L) elementwise op runs in the native
    # dtype with x re-read from the block ref (no long-lived f32 block copy).
    mask = jax.nn.sigmoid(pre).astype(o_ref.dtype)           # (nb, L)
    o_ref[...] = x_ref[...] * mask[:, None, :]


def spartial_attention(x, weight, bias, kernel_size, *, donate_x=False):
    """x: (N, C, L); weight: (1, 2, K); bias: (1,) -- Conv1d(2, 1, K) params."""
    assert kernel_size % 2 == 1, f"kernel_size = {kernel_size}"
    n, c, l = x.shape
    pad = (kernel_size - 1) // 2
    hp = _round_up(max(pad, 1), 128)          # 128-aligned left halo for the conv rows
    sw = hp + _round_up(l + pad, 128)         # scratch row width (>= pad zeros past L)

    # ---- generation-aware block sizing --------------------------------------
    try:
        vmem_cap = pltpu.get_tpu_info().vmem_capacity_bytes   # 64 MiB v7x, 128 MiB v5e/v6e
    except Exception:
        vmem_cap = 64 * 1024 * 1024
    itemsize = x.dtype.itemsize
    per_elem = (4 * c * l * itemsize          # double-buffered in + out blocks
                + 4 * c * l                   # transient f32 cast feeding the channel sum
                + 2 * 4 * sw                  # avg/mx scratch rows (incl. halo)
                + 6 * 4 * l)                  # pre/mask/per-tap f32 row temporaries
    block_budget = vmem_cap // 4              # ~32 MiB on v5e/v6e, ~16 MiB on v7x
    nb_max = max(1, block_budget // per_elem)
    # Target >= ~8 grid steps when N allows: both v7x TensorCores get work and each
    # core pipelines several steps; small N falls back to one element per step.
    nb = int(max(1, min(nb_max, n // 8))) if n >= 8 else 1
    grid = (pl.cdiv(n, nb),)                  # non-dividing nb is fine: batch rows are
                                              # independent and tail-block writes are clipped.
    vmem_limit = int(min(64 * 1024 * 1024, (vmem_cap * 3) // 4))
    # TODO(synk): if a single (1, C, L) slab ever exceeds block_budget (or N == 1 on
    # v7x), add an L-tiling "parallel" grid axis with a pad-wide halo on the rows.

    kernel = functools.partial(_spatial_attn_kernel, ksize=kernel_size, pad=pad, hp=hp)
    return pl.pallas_call(
        kernel,
        out_shape=jax.ShapeDtypeStruct((n, c, l), x.dtype),
        grid=grid,
        in_specs=[
            pl.BlockSpec(memory_space=pltpu.MemorySpace.SMEM),   # conv taps (2, K)
            pl.BlockSpec(memory_space=pltpu.MemorySpace.SMEM),   # conv bias (1,)
            pl.BlockSpec((nb, c, l), lambda b: (b, 0, 0)),       # x slab per step
        ],
        out_specs=pl.BlockSpec((nb, c, l), lambda b: (b, 0, 0)),
        scratch_shapes=[pltpu.VMEM((2, nb, sw), jnp.float32)],
        compiler_params=pltpu.CompilerParams(
            dimension_semantics=("parallel",),
            vmem_limit_bytes=vmem_limit),
        input_output_aliases=({2: 0} if donate_x else {}),
    )(weight.reshape(2, kernel_size).astype(jnp.float32),
      bias.astype(jnp.float32), x)


def _reference(x, weight, bias, kernel_size):
    pad = (kernel_size - 1) // 2
    avg = jnp.mean(x, axis=1, keepdims=True)
    mx = jnp.max(x, axis=1, keepdims=True)
    mask_in = jnp.concatenate([avg, mx], axis=1)             # (N, 2, L)
    pre = jax.lax.conv_general_dilated(
        mask_in, weight.reshape(1, 2, kernel_size),
        window_strides=(1,), padding=[(pad, pad)],
        dimension_numbers=("NCH", "OIH", "NCH")) + bias[0]
    return x * jax.nn.sigmoid(pre)


if __name__ == "__main__":
    kernel_size = 7                                          # must be odd
    key = jax.random.PRNGKey(0)
    kx, kw, kb = jax.random.split(key, 3)

    # Small deterministic example consistent with Conv1d input layout (N, C, L).
    x = jax.random.normal(kx, (2, 4, 16), dtype=jnp.float32)

    # Deterministic parameter init (Conv1d(2, 1, kernel_size) shapes).
    fan_in = 2 * kernel_size
    bound = 1.0 / (fan_in ** 0.5)
    weight = jax.random.uniform(kw, (1, 2, kernel_size), jnp.float32, -bound, bound)
    bias = jax.random.uniform(kb, (1,), jnp.float32, -bound, bound)

    out = spartial_attention(x, weight, bias, kernel_size)
    out = jax.block_until_ready(out)

    ref = _reference(x, weight, bias, kernel_size)
    assert out.shape == x.shape and out.dtype == x.dtype
    assert jnp.allclose(out, ref, atol=1e-5, rtol=1e-5), (
        "max abs err = %g" % float(jnp.max(jnp.abs(out - ref))))
    print("KERNEL_OK")
</pallas_src>

<mosaic_0001>
module attributes {stable_mosaic.version = 11 : i64} {
  func.func @_spatial_attn_kernel(%arg0: i32, %arg1: memref<2x7xf32, #tpu.memory_space<smem>>, %arg2: memref<1xf32, #tpu.memory_space<smem>>, %arg3: memref<1x4x16xf32, #tpu.memory_space<vmem>>, %arg4: memref<1x4x16xf32, #tpu.memory_space<vmem>>, %arg5: memref<2x1x256xf32, #tpu.memory_space<vmem>>) attributes {dimension_semantics = [#tpu.dimension_semantics<parallel>], iteration_bounds = array<i64: 2>, scalar_prefetch = 0 : i64, scratch_operands = 1 : i64, tpu.core_type = #tpu.core_type<tc>, window_params = [{transform_indices = @transform_0, window_bounds = array<i64: 2, 7>}, {transform_indices = @transform_1, window_bounds = array<i64: 1>}, {transform_indices = @transform_2, window_bounds = array<i64: 1, 4, 16>}, {transform_indices = @transform_3, window_bounds = array<i64: 1, 4, 16>}]} {
    %c0 = arith.constant 0 : index
    %c0_0 = arith.constant 0 : index
    %c0_1 = arith.constant 0 : index
    %0 = vector.load %arg3[%c0, %c0_0, %c0_1] : memref<1x4x16xf32, #tpu.memory_space<vmem>>, vector<1x4x16xf32>
    %cst = arith.constant dense<0.000000e+00> : vector<1x16xf32>
    %1 = vector.multi_reduction <add>, %0, %cst [1] : vector<1x4x16xf32> to vector<1x16xf32>
    %cst_2 = arith.constant 4.000000e+00 : f32
    %2 = vector.broadcast %cst_2 : f32 to vector<1x16xf32>
    %3 = arith.divf %1, %2 : vector<1x16xf32>
    %cst_3 = arith.constant dense<0xFF800000> : vector<1x16xf32>
    %4 = vector.multi_reduction <maximumf>, %0, %cst_3 [1] : vector<1x4x16xf32> to vector<1x16xf32>
    %cst_4 = arith.constant 0.000000e+00 : f32
    %5 = vector.broadcast %cst_4 : f32 to vector<2x1x256xf32>
    %c0_5 = arith.constant 0 : index
    %c0_6 = arith.constant 0 : index
    %c0_7 = arith.constant 0 : index
    %6 = vector.load %arg5[%c0_5, %c0_6, %c0_7] : memref<2x1x256xf32, #tpu.memory_space<vmem>>, vector<2x1x256xf32>
    tpu.vector_store %arg5[%c0_5, %c0_6, %c0_7], %5 {strides = array<i32>} : memref<2x1x256xf32, #tpu.memory_space<vmem>>, vector<2x1x256xf32>,
    %c0_8 = arith.constant 0 : index
    %c0_9 = arith.constant 0 : index
    %c128 = arith.constant 128 : index
    %7 = vector.load %arg5[%c0_8, %c0_9, %c128] : memref<2x1x256xf32, #tpu.memory_space<vmem>>, vector<1x1x16xf32>
    %8 = vector.shape_cast %7 : vector<1x1x16xf32> to vector<1x16xf32>
    %9 = vector.shape_cast %3 : vector<1x16xf32> to vector<1x1x16xf32>
    tpu.vector_store %arg5[%c0_8, %c0_9, %c128], %9 {strides = array<i32>} : memref<2x1x256xf32, #tpu.memory_space<vmem>>, vector<1x1x16xf32>,
    %c1 = arith.constant 1 : index
    %c0_10 = arith.constant 0 : index
    %c128_11 = arith.constant 128 : index
    %10 = vector.load %arg5[%c1, %c0_10, %c128_11] : memref<2x1x256xf32, #tpu.memory_space<vmem>>, vector<1x1x16xf32>
    %11 = vector.shape_cast %10 : vector<1x1x16xf32> to vector<1x16xf32>
    %12 = vector.shape_cast %4 : vector<1x16xf32> to vector<1x1x16xf32>
    tpu.vector_store %arg5[%c1, %c0_10, %c128_11], %12 {strides = array<i32>} : memref<2x1x256xf32, #tpu.memory_space<vmem>>, vector<1x1x16xf32>,
    %c0_12 = arith.constant 0 : index
    %c0_13 = arith.constant 0 : index
    %13 = memref.load %arg1[%c0_12, %c0_13] : memref<2x7xf32, #tpu.memory_space<smem>>
    %c0_14 = arith.constant 0 : index
    %c1_15 = arith.constant 1 : index
    %14 = memref.load %arg1[%c0_14, %c1_15] : memref<2x7xf32, #tpu.memory_space<smem>>
    %c0_16 = arith.constant 0 : index
    %c2 = arith.constant 2 : index
    %15 = memref.load %arg1[%c0_16, %c2] : memref<2x7xf32, #tpu.memory_space<smem>>
    %c0_17 = arith.constant 0 : index
    %c3 = arith.constant 3 : index
    %16 = memref.load %arg1[%c0_17, %c3] : memref<2x7xf32, #tpu.memory_space<smem>>
    %c0_18 = arith.constant 0 : index
    %c4 = arith.constant 4 : index
    %17 = memref.load %arg1[%c0_18, %c4] : memref<2x7xf32, #tpu.memory_space<smem>>
    %c0_19 = arith.constant 0 : index
    %c5 = arith.constant 5 : index
    %18 = memref.load %arg1[%c0_19, %c5] : memref<2x7xf32, #tpu.memory_space<smem>>
    %c0_20 = arith.constant 0 : index
    %c6 = arith.constant 6 : index
    %19 = memref.load %arg1[%c0_20, %c6] : memref<2x7xf32, #tpu.memory_space<smem>>
    %c1_21 = arith.constant 1 : index
    %c0_22 = arith.constant 0 : index
    %20 = memref.load %arg1[%c1_21, %c0_22] : memref<2x7xf32, #tpu.memory_space<smem>>
    %c1_23 = arith.constant 1 : index
    %c1_24 = arith.constant 1 : index
    %21 = memref.load %arg1[%c1_23, %c1_24] : memref<2x7xf32, #tpu.memory_space<smem>>
    %c1_25 = arith.constant 1 : index
    %c2_26 = arith.constant 2 : index
    %22 = memref.load %arg1[%c1_25, %c2_26] : memref<2x7xf32, #tpu.memory_space<smem>>
    %c1_27 = arith.constant 1 : index
    %c3_28 = arith.constant 3 : index
    %23 = memref.load %arg1[%c1_27, %c3_28] : memref<2x7xf32, #tpu.memory_space<smem>>
    %c1_29 = arith.constant 1 : index
    %c4_30 = arith.constant 4 : index
    %24 = memref.load %arg1[%c1_29, %c4_30] : memref<2x7xf32, #tpu.memory_space<smem>>
    %c1_31 = arith.constant 1 : index
    %c5_32 = arith.constant 5 : index
    %25 = memref.load %arg1[%c1_31, %c5_32] : memref<2x7xf32, #tpu.memory_space<smem>>
    %c1_33 = arith.constant 1 : index
    %c6_34 = arith.constant 6 : index
    %26 = memref.load %arg1[%c1_33, %c6_34] : memref<2x7xf32, #tpu.memory_space<smem>>
    %c0_35 = arith.constant 0 : index
    %27 = memref.load %arg2[%c0_35] : memref<1xf32, #tpu.memory_space<smem>>
    %28 = vector.broadcast %27 : f32 to vector<1x16xf32>
    %c0_36 = arith.constant 0 : index
    %c0_37 = arith.constant 0 : index
    %c125 = arith.constant 125 : index
    %29 = vector.load %arg5[%c0_36, %c0_37, %c125] : memref<2x1x256xf32, #tpu.memory_space<vmem>>, vector<1x1x16xf32>
    %30 = vector.shape_cast %29 : vector<1x1x16xf32> to vector<1x16xf32>
    %31 = vector.broadcast %13 : f32 to vector<1x16xf32>
    %32 = arith.mulf %31, %30 : vector<1x16xf32>
    %33 = arith.addf %28, %32 : vector<1x16xf32>
    %c1_38 = arith.constant 1 : index
    %c0_39 = arith.constant 0 : index
    %c125_40 = arith.constant 125 : index
    %34 = vector.load %arg5[%c1_38, %c0_39, %c125_40] : memref<2x1x256xf32, #tpu.memory_space<vmem>>, vector<1x1x16xf32>
    %35 = vector.shape_cast %34 : vector<1x1x16xf32> to vector<1x16xf32>
    %36 = vector.broadcast %20 : f32 to vector<1x16xf32>
    %37 = arith.mulf %36, %35 : vector<1x16xf32>
    %38 = arith.addf %33, %37 : vector<1x16xf32>
    %c0_41 = arith.constant 0 : index
    %c0_42 = arith.constant 0 : index
    %c126 = arith.constant 126 : index
    %39 = vector.load %arg5[%c0_41, %c0_42, %c126] : memref<2x1x256xf32, #tpu.memory_space<vmem>>, vector<1x1x16xf32>
    %40 = vector.shape_cast %39 : vector<1x1x16xf32> to vector<1x16xf32>
    %41 = vector.broadcast %14 : f32 to vector<1x16xf32>
    %42 = arith.mulf %41, %40 : vector<1x16xf32>
    %43 = arith.addf %38, %42 : vector<1x16xf32>
    %c1_43 = arith.constant 1 : index
    %c0_44 = arith.constant 0 : index
    %c126_45 = arith.constant 126 : index
    %44 = vector.load %arg5[%c1_43, %c0_44, %c126_45] : memref<2x1x256xf32, #tpu.memory_space<vmem>>, vector<1x1x16xf32>
    %45 = vector.shape_cast %44 : vector<1x1x16xf32> to vector<1x16xf32>
    %46 = vector.broadcast %21 : f32 to vector<1x16xf32>
    %47 = arith.mulf %46, %45 : vector<1x16xf32>
    %48 = arith.addf %43, %47 : vector<1x16xf32>
    %c0_46 = arith.constant 0 : index
    %c0_47 = arith.constant 0 : index
    %c127 = arith.constant 127 : index
    %49 = vector.load %arg5[%c0_46, %c0_47, %c127] : memref<2x1x256xf32, #tpu.memory_space<vmem>>, vector<1x1x16xf32>
    %50 = vector.shape_cast %49 : vector<1x1x16xf32> to vector<1x16xf32>
    %51 = vector.broadcast %15 : f32 to vector<1x16xf32>
    %52 = arith.mulf %51, %50 : vector<1x16xf32>
    %53 = arith.addf %48, %52 : vector<1x16xf32>
    %c1_48 = arith.constant 1 : index
    %c0_49 = arith.constant 0 : index
    %c127_50 = arith.constant 127 : index
    %54 = vector.load %arg5[%c1_48, %c0_49, %c127_50] : memref<2x1x256xf32, #tpu.memory_space<vmem>>, vector<1x1x16xf32>
    %55 = vector.shape_cast %54 : vector<1x1x16xf32> to vector<1x16xf32>
    %56 = vector.broadcast %22 : f32 to vector<1x16xf32>
    %57 = arith.mulf %56, %55 : vector<1x16xf32>
    %58 = arith.addf %53, %57 : vector<1x16xf32>
    %c0_51 = arith.constant 0 : index
    %c0_52 = arith.constant 0 : index
    %c128_53 = arith.constant 128 : index
    %59 = vector.load %arg5[%c0_51, %c0_52, %c128_53] : memref<2x1x256xf32, #tpu.memory_space<vmem>>, vector<1x1x16xf32>
    %60 = vector.shape_cast %59 : vector<1x1x16xf32> to vector<1x16xf32>
    %61 = vector.broadcast %16 : f32 to vector<1x16xf32>
    %62 = arith.mulf %61, %60 : vector<1x16xf32>
    %63 = arith.addf %58, %62 : vector<1x16xf32>
    %c1_54 = arith.constant 1 : index
    %c0_55 = arith.constant 0 : index
    %c128_56 = arith.constant 128 : index
    %64 = vector.load %arg5[%c1_54, %c0_55, %c128_56] : memref<2x1x256xf32, #tpu.memory_space<vmem>>, vector<1x1x16xf32>
    %65 = vector.shape_cast %64 : vector<1x1x16xf32> to vector<1x16xf32>
    %66 = vector.broadcast %23 : f32 to vector<1x16xf32>
    %67 = arith.mulf %66, %65 : vector<1x16xf32>
    %68 = arith.addf %63, %67 : vector<1x16xf32>
    %c0_57 = arith.constant 0 : index
    %c0_58 = arith.constant 0 : index
    %c129 = arith.constant 129 : index
    %69 = vector.load %arg5[%c0_57, %c0_58, %c129] : memref<2x1x256xf32, #tpu.memory_space<vmem>>, vector<1x1x16xf32>
    %70 = vector.shape_cast %69 : vector<1x1x16xf32> to vector<1x16xf32>
    %71 = vector.broadcast %17 : f32 to vector<1x16xf32>
    %72 = arith.mulf %71, %70 : vector<1x16xf32>
    %73 = arith.addf %68, %72 : vector<1x16xf32>
    %c1_59 = arith.constant 1 : index
    %c0_60 = arith.constant 0 : index
    %c129_61 = arith.constant 129 : index
    %74 = vector.load %arg5[%c1_59, %c0_60, %c129_61] : memref<2x1x256xf32, #tpu.memory_space<vmem>>, vector<1x1x16xf32>
    %75 = vector.shape_cast %74 : vector<1x1x16xf32> to vector<1x16xf32>
    %76 = vector.broadcast %24 : f32 to vector<1x16xf32>
    %77 = arith.mulf %76, %75 : vector<1x16xf32>
    %78 = arith.addf %73, %77 : vector<1x16xf32>
    %c0_62 = arith.constant 0 : index
    %c0_63 = arith.constant 0 : index
    %c130 = arith.constant 130 : index
    %79 = vector.load %arg5[%c0_62, %c0_63, %c130] : memref<2x1x256xf32, #tpu.memory_space<vmem>>, vector<1x1x16xf32>
    %80 = vector.shape_cast %79 : vector<1x1x16xf32> to vector<1x16xf32>
    %81 = vector.broadcast %18 : f32 to vector<1x16xf32>
    %82 = arith.mulf %81, %80 : vector<1x16xf32>
    %83 = arith.addf %78, %82 : vector<1x16xf32>
    %c1_64 = arith.constant 1 : index
    %c0_65 = arith.constant 0 : index
    %c130_66 = arith.constant 130 : index
    %84 = vector.load %arg5[%c1_64, %c0_65, %c130_66] : memref<2x1x256xf32, #tpu.memory_space<vmem>>, vector<1x1x16xf32>
    %85 = vector.shape_cast %84 : vector<1x1x16xf32> to vector<1x16xf32>
    %86 = vector.broadcast %25 : f32 to vector<1x16xf32>
    %87 = arith.mulf %86, %85 : vector<1x16xf32>
    %88 = arith.addf %83, %87 : vector<1x16xf32>
    %c0_67 = arith.constant 0 : index
    %c0_68 = arith.constant 0 : index
    %c131 = arith.constant 131 : index
    %89 = vector.load %arg5[%c0_67, %c0_68, %c131] : memref<2x1x256xf32, #tpu.memory_space<vmem>>, vector<1x1x16xf32>
    %90 = vector.shape_cast %89 : vector<1x1x16xf32> to vector<1x16xf32>
    %91 = vector.broadcast %19 : f32 to vector<1x16xf32>
    %92 = arith.mulf %91, %90 : vector<1x16xf32>
    %93 = arith.addf %88, %92 : vector<1x16xf32>
    %c1_69 = arith.constant 1 : index
    %c0_70 = arith.constant 0 : index
    %c131_71 = arith.constant 131 : index
    %94 = vector.load %arg5[%c1_69, %c0_70, %c131_71] : memref<2x1x256xf32, #tpu.memory_space<vmem>>, vector<1x1x16xf32>
    %95 = vector.shape_cast %94 : vector<1x1x16xf32> to vector<1x16xf32>
    %96 = vector.broadcast %26 : f32 to vector<1x16xf32>
    %97 = arith.mulf %96, %95 : vector<1x16xf32>
    %98 = arith.addf %93, %97 : vector<1x16xf32>
    %99 = arith.negf %98 : vector<1x16xf32>
    %100 = math.exp %99 : vector<1x16xf32>
    %cst_72 = arith.constant 1.000000e+00 : f32
    %101 = vector.broadcast %cst_72 : f32 to vector<1x16xf32>
    %102 = arith.addf %101, %100 : vector<1x16xf32>
    %103 = arith.divf %101, %102 : vector<1x16xf32>
    %c0_73 = arith.constant 0 : index
    %c0_74 = arith.constant 0 : index
    %c0_75 = arith.constant 0 : index
    %104 = vector.load %arg3[%c0_73, %c0_74, %c0_75] : memref<1x4x16xf32, #tpu.memory_space<vmem>>, vector<1x4x16xf32>
    %105 = vector.shape_cast %103 : vector<1x16xf32> to vector<1x1x16xf32>
    %106 = vector.broadcast %105 : vector<1x1x16xf32> to vector<1x4x16xf32>
    %107 = arith.mulf %104, %106 : vector<1x4x16xf32>
    %c0_76 = arith.constant 0 : index
    %c0_77 = arith.constant 0 : index
    %c0_78 = arith.constant 0 : index
    %108 = vector.load %arg4[%c0_76, %c0_77, %c0_78] : memref<1x4x16xf32, #tpu.memory_space<vmem>>, vector<1x4x16xf32>
    tpu.vector_store %arg4[%c0_76, %c0_77, %c0_78], %107 {strides = array<i32>} : memref<1x4x16xf32, #tpu.memory_space<vmem>>, vector<1x4x16xf32>,
    return
  }
  func.func @transform_0(%arg0: i32) -> (i32, i32) {
    %c0_i32 = arith.constant 0 : i32
    %c0_i32_0 = arith.constant 0 : i32
    %c0_i32_1 = arith.constant 0 : i32
    return %c0_i32, %c0_i32_0 : i32, i32
  }
  func.func @transform_1(%arg0: i32) -> i32 {
    %c0_i32 = arith.constant 0 : i32
    %c0_i32_0 = arith.constant 0 : i32
    return %c0_i32 : i32
  }
  func.func @transform_2(%arg0: i32) -> (i32, i32, i32) {
    %c0_i32 = arith.constant 0 : i32
    %c0_i32_0 = arith.constant 0 : i32
    %c0_i32_1 = arith.constant 0 : i32
    return %arg0, %c0_i32, %c0_i32_0 : i32, i32, i32
  }
  func.func @transform_3(%arg0: i32) -> (i32, i32, i32) {
    %c0_i32 = arith.constant 0 : i32
    %c0_i32_0 = arith.constant 0 : i32
    %c0_i32_1 = arith.constant 0 : i32
    return %arg0, %c0_i32, %c0_i32_0 : i32, i32, i32
  }
}

</mosaic_0001>

<bundles_post_ra>
// kernel: tpu_custom_call.1
= control target key start
LH: loop header
LB: loop body
LE: loop exit
PB: predicated region body
PF: predicated region fallthrough
CT: control target
= control target key end

     0   :  { %s957_s0 = inlined_call_operand.vmem [shape: f32[2,7], index: 0, kind: input, shape index: {}]   ;;  %s958_s1 = inlined_call_operand.<no memory space> [shape: f32[1], index: 1, kind: input, shape index: {}]   ;;  %s959_s2 = inlined_call_operand.hbm [shape: f32[2,4,16], index: 2, kind: input, shape index: {}]   ;;  %s960_s3 = inlined_call_operand.hbm [shape: f32[2,4,16], index: 3, kind: output, shape index: {}]  }
   0x1   :  { %8 = sst [smem:[#allocation3]] %s958_s1 }
   0x2   :  { %9 = vsyncpa [#allocation7], 0 }
   0x3   :  { %10 = vsyncpa [#allocation5], 0 }
   0x4   :  { %12 = vsyncpa [#allocation5 + $0x1], 0 }
   0x5   :  { %13 = vsyncpa [#allocation6], 0 }
   0x6   :  { %15 = vsyncpa [#allocation6 + $0x1], 0  ;;  %s739_s14 = smov 0   ;;  %s741_s15 = smov 0  }
   0x7   :  { %s743_s16 = smov 0   ;;  %s745_s17 = smov 0  }
   0x8 LB: > { %s760_s1 = sadd.s32 4294967295, %s703_s17   ;;  %s491_s18 = sadd.s32 4294967294, %s703_s17   ;;  %s703_s17 = sphi %s745_s17, %s981_s17   ;;  %s699_s16 = sphi %s743_s16, %s980_s16   ;;  %s695_s15 = sphi %s741_s15, %s979_s15   ;;  %s691_s14 = sphi %s739_s14, %s978_s14  }
   0x9   : > { %p83_p0 = scmp.ne.s32.totalorder %s695_s15, %s691_s14  ;;  %p961_p1 = scmp.eq.s32.totalorder %s760_s1, 0 }
   0xa   : > { %p113_p3 = scmp.eq.s32.totalorder %s491_s18, 1  ;;  %p492_p5 = scmp.ge.s32.totalorder %s703_s17, 1 }
   0xb   : > { %p769_p4 = por %p961_p1, %p83_p0  ;;  %p120_p7 = scmp.lt.s32.totalorder %s703_s17, 3 }
   0xc   : > { %p774_p6 = por %p113_p3, %p83_p0  ;;  %s133_s23 = sshll.u32 %s957_s0, 4  ;;  %s134_s23 = int_to_ptr.vmem [resolvable:$true] %s133_s23 }
   0xd   : > { %s964_s19 = scalar_select %p769_p4, 1, 0 }
   0xe   : > { %s965_s20 = scalar_select %p774_p6, 1, 0 }
   0xf   : > { %p782_p8 = pnand %p492_p5, %p120_p7  ;;  %s790_s25 = sadd.s32 1, %s703_s17  }
  0x10   : > { %s67_s27 = ssub.s32 %s703_s17, %s790_s25  ;;  %s70_s29 = sadd.s32 1, %s699_s16 }
  0x11   : > { %p527_p10 = pneg %p782_p8  ;;  %p800_p12 = scmp.eq.s32.totalorder %s67_s27, 0 }
  0x12   : > { %p77_p13 = scmp.ne.s32.totalorder %s699_s16, %s695_s15  ;;  %s588_s30 = scalar_lea.vmem %s134_s23, 32 }
  0x13   : > { %p794_p11 = pnand %p527_p10, %p961_p1  ;;  %p589_p0 = scmp.ne.s32.totalorder %s134_s23, %s588_s30 }
  0x14   : > { %p596_p9 = scmp.lt.s32.totalorder %s134_s23, %s134_s23  ;;  %p597_p2 = scmp.lt.s32.totalorder %s588_s30, %s588_s30 }
  0x15   : > { %p590_p3 = pneg %p794_p11 }
  0x16   : > { %p598_p10 = por %p597_p2, %p596_p9 }
  0x17   : > { %p591_p5 = pnand %p590_p3, %p589_p0 }
  0x19   : > { %p592_p7 = pneg %p591_p5 }
  0x1b   : > { %p599_p1 = pnand %p598_p10, %p592_p7 }
  0x1d   : > { %602 = shalt.err (!%p599_p1)
}
  0x1e   : > { %s705_s4 = smov [#allocation4]   ;;  %p78_p2 = scmp.eq.s32.totalorder %s703_s17, 0 }
  0x1f   : > { %530 = dma.vmem_to_smem (!%p794_p11), %s134_s23, 32, %s705_s4, [#allocation7]  }
  0x20   : > { %s814_s5 = scalar_select %p800_p12, %s699_s16, %s70_s29  }
  0x21   : > { %p969_p1 = scmp.eq.s32.totalorder %s760_s1, 1  ;;  %p540_p0 = scmp.lt.s32.totalorder %s703_s17, 2 }
  0x22   : > { %s147_s7 = sand.u32 1, %s699_s16   ;;  %p79_p3 = por %p78_p2, %p77_p13 }
  0x23   : > { %p822_p9 = por %p969_p1, %p77_p13  ;;  %s495_s8 = sshll.u32 %s147_s7, 2 }
  0x24   : > { %s496_s9 = sshll.u32 %s703_s17, 6  ;;  %s151_s13 = scalar_lea.vmem [#allocation8], %s495_s8 }
  0x25   : > { %s970_s6 = scalar_select %p822_p9, 1, 0 }
  0x26   : > { %s835_s12 = scalar_lea.hbm %s959_s2, %s496_s9  ;;  %s158_s18 = sshll.u32 %s151_s13, 4  ;;  %s841_s18 = int_to_ptr.vmem [resolvable:$true] %s158_s18 }
  0x27   : > { %p837_p11 = pnand %p540_p0, %p79_p3  ;;  %s148_s22 = scalar_lea.sflag [#allocation5], %s147_s7 }
  0x28   : > { %s603_s23 = scalar_lea.hbm %s835_s12, 64  ;;  %s608_s28 = scalar_lea.hbm %s959_s2, 128 }
  0x29   : > { %p604_p12 = scmp.ne.s32.totalorder %s835_s12, %s603_s23  ;;  %p605_p13 = pneg %p837_p11 }
  0x2a   : > { %p609_p10 = scmp.lt.u32.totalorder %s835_s12, %s959_s2  ;;  %p610_p2 = scmp.lt.u32.totalorder %s608_s28, %s603_s23 }
  0x2b   : > { %p606_p5 = pnand %p605_p13, %p604_p12  ;;  %p612_p0 = scmp.lt.u32.totalorder %s603_s23, %s835_s12 }
  0x2c   : > { %p611_p1 = por %p610_p2, %p609_p10 }
  0x2d   : > { %p607_p7 = pneg %p606_p5 }
  0x2e   : > { %p613_p3 = por %p612_p0, %p611_p1 }
  0x30   : > { %p614_p6 = pnand %p613_p3, %p607_p7 }
  0x32   : > { %617 = shalt.err (!%p614_p6)
}
  0x33   : > { %s618_s4 = scalar_lea.vmem %s841_s18, 64  ;;  %s706_s7 = smov [#allocation8]  }
  0x34   : > { %p619_p12 = scmp.ne.s32.totalorder %s841_s18, %s618_s4  ;;  %s623_s8 = sshll.u32 %s706_s7, 4  ;;  %s624_s8 = int_to_ptr.vmem [resolvable:$false] %s623_s8 }
  0x35   : > { %s625_s9 = scalar_lea.vmem %s624_s8, 128  ;;  %p626_p4 = scmp.lt.s32.totalorder %s841_s18, %s624_s8 }
  0x36   : > { %p621_p5 = pnand %p619_p12, %p605_p13  ;;  %p627_p10 = scmp.lt.s32.totalorder %s625_s9, %s618_s4 }
  0x38   : > { %p622_p9 = pneg %p621_p5  ;;  %p628_p2 = por %p627_p10, %p626_p4 }
  0x3a   : > { %p629_p1 = pnand %p628_p2, %p622_p9 }
  0x3c   : > { %632 = shalt.err (!%p629_p1)
}
  0x3d   : > { %534 = dma.hbm_to_vmem [thread:$0]  (!%p837_p11), %s835_s12, 64, %s841_s18, %s148_s22  }
  0x3e   : > { %167 = sbr.rel (%p782_p8) target bundleno = 406 (0x196), region = 32  ;;  %p972_p6 = scmp.eq.s32.totalorder (!%p782_p8), %s760_s1, 0 }
  0x45   : > { %678 = dma.done.wait (%p972_p6), [#allocation7], 32   ;;  %p973_p13 = pmov %p972_p6 }
  0x46   : > { %s875_s10 = sand.u32 1, %s695_s15   ;;  %p974_p4 = scmp.ne.s32.totalorder %s964_s19, 0 }
  0x47   : > { %680 = vsyncadd (%p973_p13), [#allocation7], 4294967264  ;;  %s499_s11 = sshll.u32 %s875_s10, 2  ;;  %s174_s13 = scalar_lea.sflag [#allocation5], %s875_s10 }
  0x48   : > { %s881_s12 = scalar_lea.vmem [#allocation8], %s499_s11 }
  0x49   : > { %682 = dma.done.wait (%p974_p4), %s174_s13, 64  }
  0x4a   : > { %684 = vsyncadd (%p974_p4), %s174_s13, 4294967232 }
  0x4b   : > { %182 = sfence }
  0x4c   : > { %v201_v0 = vld [vmem:[%s881_s12] sm:$0xf]  ;;  %vm202_vm0 = vcmask 125952   ;;  %v219_v1 = vlaneseq  ;;  %v707_v5 = vmov 0.0   ;;  %s230_s19 = sld [smem:[#allocation4]]  ;;  %s501_s24 = sld [smem:[#allocation4 + $0x1]] }
  0x4d   : > { %v203_v2 = vsel %vm202_vm0, %v201_v0, 0.0  ;;  %v212_v3 = vsel %vm202_vm0, %v201_v0, -inf  ;;  %s502_s18 = sld [smem:[#allocation4 + $0x2]]  ;;  %s508_s21 = sld [smem:[#allocation4 + $0x81]]  ;;  %vm260_vm3 = vcmask 1039360   ;;  %vm279_vm4 = vcmask 1031168  }
  0x4e   : > { %v204_v4 = vrot.slane %v203_v2, 4  ;;  %vm221_vm1 = vcmp.lt.s32.totalorder %v219_v1, 256  ;;  %v213_v6 = vrot.slane %v212_v3, 4  ;;  %vm225_vm2 = vcmp.lt.s32.totalorder %v219_v1, 16  ;;  %s509_s22 = sld [smem:[#allocation4 + $0x82]]  ;;  %s507_s23 = sld [smem:[#allocation4 + $0x80]] }
  0x4f   : > { %223 = vst.msk [vmem:[#allocation2] sm:$0x3] %vm221_vm1, %v707_v5  ;;  %224 = vst.msk [vmem:[#allocation2 + $0x2] sm:$0x3] %vm221_vm1, %v707_v5  ;;  %s244_s26 = sld [smem:[#allocation3]]  ;;  %s892_s27 = sld [smem:[#allocation4 + $0x3]] }
  0x50   : > { %v205_v7 = vadd.f32 %v204_v4, %v203_v2  ;;  %v214_v8 = vmax.f32 %v212_v3, %v213_v6  ;;  %s894_s28 = sld [smem:[#allocation4 + $0x83]]  ;;  %s896_s29 = sld [smem:[#allocation4 + $0x4]]  ;;  %vm299_vm5 = vcmask 1022976   ;;  %vm319_vm6 = vcmask 1014784  }
  0x51   : > { %s898_s30 = sld [smem:[#allocation4 + $0x84]]  ;;  %s708_s4 = smov 127   ;;  %vm338_vm7 = vcmask 1006592   ;;  %vm357_vm8 = vcmask 998400   ;;  %vm390_vm9 = vcmask 23552  }
  0x52   : > { %v206_v9 = vrot.slane %v205_v7, 2  ;;  %v215_v10 = vrot.slane %v214_v8, 2  ;;  %v247_v18 = vstv %s230_s19  ;;  %v254_v19 = vstv %s501_s24  ;;  %s709_s7 = smov 126   ;;  %s505_s8 = sld [smem:[#allocation4 + $0x5]] }
  0x53   : > { %v273_v20 = vstv %s502_s18  ;;  %v264_v22 = vstv %s508_s21  ;;  %s512_s9 = sld [smem:[#allocation4 + $0x85]]  ;;  %s506_s13 = sld [smem:[#allocation4 + $0x6]] }
  0x54   : > { %v207_v11 = vadd.f32 %v206_v9, %v205_v7  ;;  %v216_v12 = vmax.f32 %v214_v8, %v215_v10  ;;  %v283_v24 = vstv %s509_s22  ;;  %v251_v26 = vstv %s507_s23  ;;  %s513_s19 = sld [smem:[#allocation4 + $0x86]]  ;;  %s710_s24 = smov 125  }
  0x55   : > { %v245_v25 = vstv %s244_s26  ;;  %v293_v35 = vstv %s892_s27  ;;  %s711_s18 = smov 124   ;;  %s712_s21 = smov 123  }
  0x56   : > { %v208_v13 = vrot.slane %v207_v11, 1  ;;  %v217_v14 = vrot.slane %v216_v12, 1  ;;  %v304_v37 = vstv %s894_s28  ;;  %v313_v41 = vstv %s896_s29  ;;  %s713_s22 = smov 122   ;;  %s714_s23 = smov 3  }
  0x57   : > { %v323_v42 = vstv %s898_s30  ;;  %s516_s26 = sshll.u32 %s760_s1, 6  ;;  %s200_s27 = scalar_lea.vmem [#allocation9], %s499_s11 }
  0x58   : > { %v209_v15 = vadd.f32 %v208_v13, %v207_v11  ;;  %v218_v16 = vmax.f32 %v216_v12, %v217_v14  ;;  %v332_v45 = vstv %s505_s8  ;;  %s409_s28 = sshll.u32 %s200_s27, 4  ;;  %s396_s1 = scalar_lea.sflag [#allocation6], %s875_s10  ;;  %s914_s28 = int_to_ptr.vmem [resolvable:$true] %s409_s28 }
  0x59   : > { %v342_v46 = vstv %s512_s9  ;;  %v351_v49 = vstv %s506_s13  ;;  %p975_p9 = scmp.ne.s32.totalorder %s970_s6, 0  ;;  %s715_s11 = smov [#allocation9]  }
  0x5a   : > { %v211_v17 = vmul.f32 0.25, %v209_v15  ;;  %229 = vst.msk [vmem:[#allocation2 + $0x3] sm:$0x1] %vm225_vm2, %v218_v16  ;;  %v361_v50 = vstv %s513_s19 }
  0x5c   : > { %227 = vst.msk [vmem:[#allocation2 + $0x1] sm:$0x1] %vm225_vm2, %v211_v17 }
  0x61   : > { %v250_v21 = vld [vmem:[#allocation2 + $0x2] sm:$0x3] }
  0x62   : > { %v265_v30 = vmul.f32 %v264_v22, %v250_v21  ;;  %v284_v31 = vmul.f32 %v283_v24, %v250_v21  ;;  %v252_v32 = vmul.f32 %v251_v26, %v250_v21  ;;  %v303_v36 = vld [vmem:[#allocation2 + $0x3] sm:$0x1] }
  0x63   : > { %v246_v23 = vld [vmem:[#allocation2] sm:$0x3]  ;;  %v305_v40 = vmul.f32 %v304_v37, %v303_v36  ;;  %v324_v44 = vmul.f32 %v323_v42, %v303_v36  ;;  %v343_v48 = vmul.f32 %v342_v46, %v303_v36  ;;  %v362_v52 = vmul.f32 %v361_v50, %v303_v36 }
  0x64   : > { %v255_v27 = vmul.f32 %v254_v19, %v246_v23  ;;  %v248_v28 = vmul.f32 %v247_v18, %v246_v23  ;;  %v274_v29 = vmul.f32 %v273_v20, %v246_v23  ;;  %v292_v34 = vld [vmem:[#allocation2 + $0x1] sm:$0x1] }
  0x65   : > { %v294_v39 = vmul.f32 %v293_v35, %v292_v34  ;;  %v314_v43 = vmul.f32 %v313_v41, %v292_v34  ;;  %v333_v47 = vmul.f32 %v332_v45, %v292_v34  ;;  %v352_v51 = vmul.f32 %v351_v49, %v292_v34 }
  0x66   : > { %257 = vrot.lane.b32.xlu0 %v255_v27, %s708_s4  ;;  %276 = vrot.lane.b32.xlu1 %v274_v29, %s709_s7  ;;  %v249_v33 = vadd.f32 %v248_v28, %v245_v25  ;;  %v379_v41 = vshrl.u32 %v219_v1, 7 }
  0x68   : > { %v253_v38 = vadd.f32 %v252_v32, %v249_v33  ;;  %v384_v42 = vsub.s32 1, %v379_v41 }
  0x6a   : > { %267 = vrot.lane.b32.xlu0 %v265_v30, %s708_s4  ;;  %286 = vrot.lane.b32.xlu1 %v284_v31, %s709_s7  ;;  %s912_s4 = scalar_lea.hbm %s960_s3, %s516_s26  ;;  %s637_s7 = sshll.u32 %s715_s11, 4  ;;  %s638_s7 = int_to_ptr.vmem [resolvable:$false] %s637_s7 }
  0x6b   : > { %s639_s8 = scalar_lea.vmem %s638_s7, 128  ;;  %p640_p0 = scmp.lt.s32.totalorder %s914_s28, %s638_s7 }
  0x6e   : > { %296 = vrot.lane.b32.xlu0 %v294_v39, %s710_s24  ;;  %307 = vrot.lane.b32.xlu1 %v305_v40, %s710_s24 }
  0x72   : > { %316 = vrot.lane.b32.xlu0 %v314_v43, %s711_s18  ;;  %326 = vrot.lane.b32.xlu1 %v324_v44, %s711_s18  ;;  %v380_v43 = vsub.s32 0, %v379_v41 }
  0x76   : > { %335 = vrot.lane.b32.xlu0 %v333_v47, %s712_s21  ;;  %345 = vrot.lane.b32.xlu1 %v343_v48, %s712_s21  ;;  %v376_v47 = vld [vmem:[%s881_s12] sm:$0xf]  ;;  %s633_s12 = scalar_lea.vmem %s914_s28, 64 }
  0x77   : > { %p634_p8 = scmp.ne.s32.totalorder %s914_s28, %s633_s12  ;;  %p641_p3 = scmp.lt.s32.totalorder %s639_s8, %s633_s12 }
  0x79   : > { %p635_p11 = pnand %p634_p8, %p975_p9  ;;  %p642_p12 = por %p641_p3, %p640_p0 }
  0x7a   : > { %354 = vrot.lane.b32.xlu0 %v352_v51, %s713_s22  ;;  %364 = vrot.lane.b32.xlu1 %v362_v52, %s713_s22 }
  0x7b   : > { %p636_p7 = pneg %p635_p11 }
  0x7d   : > { %p643_p5 = pnand %p642_p12, %p636_p7 }
  0xd8   : > { %v258_v53 = vpop.permute.xlu0 %257  ;;  %v277_v54 = vpop.permute.xlu1 %276 }
  0xd9   : > { %v259_v55 = vrot.slane %v258_v53, 1  ;;  %v278_v59 = vrot.slane %v277_v54, 1 }
  0xdb   : > { %v261_v56 = vsel %vm260_vm3, %v258_v53, %v259_v55  ;;  %v280_v4 = vsel %vm279_vm4, %v277_v54, %v278_v59 }
  0xdc   : > { %v268_v57 = vpop.permute.xlu0 %267  ;;  %v287_v58 = vpop.permute.xlu1 %286  ;;  %v263_v61 = vadd.f32 %v261_v56, %v253_v38 }
  0xdd   : > { %v269_v60 = vrot.slane %v268_v57, 1  ;;  %v288_v63 = vrot.slane %v287_v58, 1 }
  0xdf   : > { %v270_v62 = vsel %vm260_vm3, %v268_v57, %v269_v60  ;;  %v289_v7 = vsel %vm279_vm4, %v287_v58, %v288_v63 }
  0xe0   : > { %v272_v0 = vadd.f32 %v270_v62, %v263_v61  ;;  %v297_v2 = vpop.permute.xlu0 %296  ;;  %v308_v3 = vpop.permute.xlu1 %307 }
  0xe1   : > { %v298_v5 = vrot.slane %v297_v2, 7  ;;  %v309_v8 = vrot.slane %v308_v3, 7 }
  0xe2   : > { %v282_v6 = vadd.f32 %v280_v4, %v272_v0 }
  0xe3   : > { %v300_v12 = vsel %vm299_vm5, %v298_v5, %v297_v2  ;;  %v310_v15 = vsel %vm299_vm5, %v309_v8, %v308_v3 }
  0xe4   : > { %v291_v9 = vadd.f32 %v289_v7, %v282_v6  ;;  %v317_v10 = vpop.permute.xlu0 %316  ;;  %v327_v11 = vpop.permute.xlu1 %326 }
  0xe5   : > { %v318_v13 = vrot.slane %v317_v10, 7  ;;  %v328_v16 = vrot.slane %v327_v11, 7 }
  0xe6   : > { %v302_v14 = vadd.f32 %v300_v12, %v291_v9 }
  0xe7   : > { %v320_v20 = vsel %vm319_vm6, %v318_v13, %v317_v10  ;;  %v329_v23 = vsel %vm319_vm6, %v328_v16, %v327_v11 }
  0xe8   : > { %v312_v17 = vadd.f32 %v310_v15, %v302_v14  ;;  %v336_v18 = vpop.permute.xlu0 %335  ;;  %v346_v19 = vpop.permute.xlu1 %345 }
  0xe9   : > { %v337_v21 = vrot.slane %v336_v18, 7  ;;  %v347_v24 = vrot.slane %v346_v19, 7 }
  0xea   : > { %v322_v22 = vadd.f32 %v320_v20, %v312_v17 }
  0xeb   : > { %v339_v28 = vsel %vm338_vm7, %v337_v21, %v336_v18  ;;  %v348_v31 = vsel %vm338_vm7, %v347_v24, %v346_v19 }
  0xec   : > { %v331_v25 = vadd.f32 %v329_v23, %v322_v22  ;;  %v355_v26 = vpop.permute.xlu0 %354  ;;  %v365_v27 = vpop.permute.xlu1 %364 }
  0xed   : > { %v356_v29 = vrot.slane %v355_v26, 7  ;;  %v366_v32 = vrot.slane %v365_v27, 7 }
  0xee   : > { %v341_v30 = vadd.f32 %v339_v28, %v331_v25 }
  0xef   : > { %v358_v34 = vsel %vm357_vm8, %v356_v29, %v355_v26  ;;  %v367_v36 = vsel %vm357_vm8, %v366_v32, %v365_v27 }
  0xf0   : > { %v350_v33 = vadd.f32 %v348_v31, %v341_v30 }
  0xf2   : > { %v360_v35 = vadd.f32 %v358_v34, %v350_v33 }
  0xf4   : > { %v369_v37 = vadd.f32 %v367_v36, %v360_v35 }
  0xf6   : > { %v514_v38 = vmul.f32 -1.442695, %v369_v37 }
  0xf8   : > { %584 = vpow2.f32 %v514_v38 }
 0x102   : > { %v585_v39 = vpop.eup %584 }
 0x103   : > { %v373_v40 = vadd.f32 1.0, %v585_v39 }
 0x105   : > { %586 = vrcp.f32 %v373_v40 }
 0x10f   : > { %v587_v44 = vpop.eup %586 }
 0x110   : > { %v385_v45 = vrot.slane %v587_v44, %v384_v42  ;;  %v381_v46 = vrot.slane %v587_v44, %v380_v43 }
 0x112   : > { %388 = vrot.lane.b32.xlu1 %v385_v45, %s714_s23  ;;  %386 = vrot.lane.b32.xlu0 %v381_v46, %s714_s23 }
 0x184   : > { %v389_v48 = vpop.permute.xlu1 %388  ;;  %v387_v49 = vpop.permute.xlu0 %386 }
 0x185   : > { %v391_v50 = vsel %vm390_vm9, %v387_v49, %v389_v48 }
 0x186   : > { %v393_v1 = vmul.f32 %v391_v50, %v376_v47 }
 0x188   : > { %394 = vst.msk [vmem:[%s200_s27] sm:$0xf] %vm202_vm0, %v393_v1 }
 0x189   : > { %646 = shalt.err (!%p643_p5)
}
 0x18a   : > { %s647_s10 = scalar_lea.hbm %s912_s4, 64  ;;  %s651_s19 = scalar_lea.hbm %s960_s3, 128 }
 0x18b   : > { %p648_p10 = scmp.ne.s32.totalorder %s912_s4, %s647_s10  ;;  %p652_p6 = scmp.lt.u32.totalorder %s912_s4, %s960_s3 }
 0x18c   : > { %p653_p13 = scmp.lt.u32.totalorder %s651_s19, %s647_s10  ;;  %p655_p8 = scmp.lt.u32.totalorder %s647_s10, %s912_s4 }
 0x18d   : > { %p649_p2 = pnand %p648_p10, %p975_p9 }
 0x18e   : > { %p654_p4 = por %p653_p13, %p652_p6 }
 0x18f   : > { %p650_p1 = pneg %p649_p2 }
 0x190   : > { %p656_p11 = por %p655_p8, %p654_p4 }
 0x192   : > { %p657_p7 = pnand %p656_p11, %p650_p1 }
 0x194   : > { %660 = shalt.err (!%p657_p7)
}
 0x195   : > { %525 = dma.vmem_to_hbm [thread:$0]  (%p975_p9), %s914_s28, 64, %s912_s4, %s396_s1  }
 0x196 PF: > { %s421_s21 = sand.u32 1, %s691_s14   ;;  %p976_p0 = scmp.ne.s32.totalorder %s965_s20, 0 }
 0x197   : > { %p977_p3 = scmp.ge.s32.totalorder %s703_s17, 2  ;;  %s422_s22 = scalar_lea.sflag [#allocation6], %s421_s21 }
 0x199   : > { %p536_p12 = pnand %p977_p3, %p976_p0 }
 0x19b   : > { %686 = dma.done.wait (!%p536_p12), %s422_s22, 64  }
 0x19c   : > { %688 = vsyncadd (!%p536_p12), %s422_s22, 4294967232  ;;  %p18_p5 = scmp.ge.s32.totalorder %s790_s25, 4   ;;  %s978_s14 = smov %s695_s15 }
 0x19d   : > { %s979_s15 = smov %s699_s16  ;;  %s980_s16 = smov %s814_s5 }
 0x19e   : > { %s981_s17 = smov %s790_s25  ;;  %20 = sbr.rel (!%p18_p5) target bundleno = 8 (0x8), region = 83 }
 0x1a5   :  { %427 = vsyncpa [#allocation5], 1 }
 0x1a6   :  { %429 = vsyncpa [#allocation5 + $0x1], 1 }
 0x1a7   :  { %430 = vsyncpa [#allocation6], 1 }
 0x1a8   :  { %432 = vsyncpa [#allocation6 + $0x1], 1 }
 0x1a9   :  { %433 = vsyncpa [#allocation7], 1 }
 0x1aa   :  { %435 = vsyncpa [#allocation7 + $0x1], 1 }

</bundles_post_ra>
